<compile_context>
chip_gen: v7x
topology: tpu7x:2x2x1
jax: 0.10.0
libtpu: 0.0.40
codegen_flags: <defaults>
</compile_context>

<pallas_src>
import jax
import jax.numpy as jnp
from jax.experimental import pallas as pl
from jax.experimental.pallas import tpu as pltpu

# Model config (consistent with the module's __init__)
VOCAB = 50          # Config.vocab_size
EMB = 32            # Config.embedding_size
H1 = 200            # hidden_size1
H2 = 100            # hidden_size2
OUT = 4             # Config.output_size

# Lane-padded widths used inside the kernel.
VOCAB_PAD = 128
H1P = 256
H2P = 128
OUTP = 128


def prepare_params(emb_table, w1, b1, w2, b2, w3, b3, dtype=jnp.float32):
    """One-time parameter prep (run at init, NOT per forward call).

    Fuses Embedding+fc1 into a single lookup table and zero-pads every
    feature dimension to a lane multiple of 128."""
    t1 = emb_table @ w1 + jnp.reshape(b1, (1, H1))            # (VOCAB, H1)
    t1p = jnp.zeros((VOCAB_PAD, H1P), dtype).at[:VOCAB, :H1].set(t1.astype(dtype))
    w2p = jnp.zeros((H1P, H2P), dtype).at[:H1, :H2].set(w2.astype(dtype))
    b2p = jnp.zeros((1, H2P), dtype).at[:, :H2].set(jnp.reshape(b2, (1, H2)).astype(dtype))
    w3p = jnp.zeros((H2P, OUTP), dtype).at[:H2, :OUT].set(w3.astype(dtype))
    b3p = jnp.zeros((1, OUTP), dtype).at[:, :OUT].set(jnp.reshape(b3, (1, OUT)).astype(dtype))
    return (t1p, w2p, b2p, w3p, b3p)


def mlp_kernel(tok_ref, t1_ref, w2_ref, b2_ref, w3_ref, b3_ref, o_ref):
    """tok_ref : (B_pad, S) int32 token ids (VMEM).
    t1_ref  : (VOCAB_PAD, H1P)  fused emb@W1+b1 table.
    w2_ref/b2_ref, w3_ref/b3_ref : lane-padded fc2/fc3 params.
    o_ref   : (B_pad, OUTP) float32 logits (lane/sublane dense)."""
    b_pad = o_ref.shape[0]
    seq_len = tok_ref.shape[1]

    # Last-token id per row, then a one-hot (B_pad, VOCAB_PAD) built fully
    # vectorized on the VPU.  The gather itself rides the MXU.
    toks = tok_ref[...]                                        # (B_pad, S)
    last = toks[:, seq_len - 1:seq_len]                        # (B_pad, 1)
    col = jax.lax.broadcasted_iota(jnp.int32, (b_pad, VOCAB_PAD), 1)
    onehot = (col == last).astype(t1_ref.dtype)                # (B_pad, VOCAB_PAD)

    # h1 = tanh(emb[tok] @ W1 + b1) == tanh(one_hot @ T1)
    h1 = jnp.tanh(
        jnp.dot(onehot, t1_ref[...], preferred_element_type=jnp.float32)
    )
    h2 = jnp.tanh(
        jnp.dot(h1.astype(w2_ref.dtype), w2_ref[...],
                preferred_element_type=jnp.float32)
        + b2_ref[...].astype(jnp.float32)
    )
    out = (
        jnp.dot(h2.astype(w3_ref.dtype), w3_ref[...],
                preferred_element_type=jnp.float32)
        + b3_ref[...].astype(jnp.float32)
    )
    o_ref[...] = out.astype(o_ref.dtype)


@jax.jit
def mlp_forward(tokens, params):
    """tokens: (B, S) int token ids.  params: output of prepare_params().
    Returns (B, OUT) float32 logits."""
    t1p, w2p, b2p, w3p, b3p = params
    B, _ = tokens.shape
    b_pad = pl.cdiv(B, 8) * 8                                  # sublane-dense batch
    tok = jnp.pad(tokens.astype(jnp.int32), ((0, b_pad - B), (0, 0)))

    out_padded = pl.pallas_call(
        mlp_kernel,
        out_shape=jax.ShapeDtypeStruct((b_pad, OUTP), jnp.float32),
        in_specs=[
            pl.BlockSpec(memory_space=pltpu.MemorySpace.VMEM),  # tokens
            pl.BlockSpec(memory_space=pltpu.MemorySpace.VMEM),  # T1 (emb@W1+b1)
            pl.BlockSpec(memory_space=pltpu.MemorySpace.VMEM),  # w2
            pl.BlockSpec(memory_space=pltpu.MemorySpace.VMEM),  # b2
            pl.BlockSpec(memory_space=pltpu.MemorySpace.VMEM),  # w3
            pl.BlockSpec(memory_space=pltpu.MemorySpace.VMEM),  # b3
        ],
        out_specs=pl.BlockSpec(memory_space=pltpu.MemorySpace.VMEM),
    )(tok, t1p, w2p, b2p, w3p, b3p)

    return out_padded[:B, :OUT]                                 # (B, OUT)


def mlp_reference(tokens, emb_table, w1, b1, w2, b2, w3, b3):
    """Pure-JAX mirror of the *full* PyTorch forward (all timesteps)."""
    emb = jnp.take(emb_table, tokens, axis=0)        # (B, S, E)
    x = jnp.transpose(emb, (1, 0, 2))                # (S, B, E)  == permute(1,0,2)
    x = jnp.tanh(x @ w1 + b1[0])
    x = jnp.tanh(x @ w2 + b2[0])
    return x[-1] @ w3 + b3[0]                        # (B, OUT)


if __name__ == "__main__":
    key = jax.random.PRNGKey(0)
    k_emb, k_w1, k_b1, k_w2, k_b2, k_w3, k_b3, k_tok = jax.random.split(key, 8)

    B, S = 2, 8  # batch=2, seq=8

    # Deterministic synthetic parameters (nn.Linear stored as (in, out) here).
    emb_table = jax.random.normal(k_emb, (VOCAB, EMB), jnp.float32)
    w1 = jax.random.normal(k_w1, (EMB, H1), jnp.float32) * 0.1
    b1 = jax.random.normal(k_b1, (1, H1), jnp.float32) * 0.1
    w2 = jax.random.normal(k_w2, (H1, H2), jnp.float32) * 0.1
    b2 = jax.random.normal(k_b2, (1, H2), jnp.float32) * 0.1
    w3 = jax.random.normal(k_w3, (H2, OUT), jnp.float32) * 0.1
    b3 = jax.random.normal(k_b3, (1, OUT), jnp.float32) * 0.1

    tokens = jax.random.randint(k_tok, (B, S), 0, VOCAB, dtype=jnp.int32)

    # One-time init: fuse emb+fc1 and pre-pad all weights (out of the hot path).
    # For v6e/v7x, dtype=jnp.bfloat16 halves the per-call weight DMA.
    params = prepare_params(emb_table, w1, b1, w2, b2, w3, b3, dtype=jnp.float32)
    params = jax.block_until_ready(params)

    out = mlp_forward(tokens, params)
    out = jax.block_until_ready(out)

    ref = mlp_reference(tokens, emb_table, w1, b1, w2, b2, w3, b3)
    assert out.shape == (B, OUT), out.shape
    assert jnp.allclose(out, ref, atol=1e-4, rtol=1e-4), (out, ref)

    print("KERNEL_OK")
</pallas_src>

<mosaic_0001>
module attributes {stable_mosaic.version = 11 : i64} {
  func.func @mlp_kernel(%arg0: memref<8x8xi32, #tpu.memory_space<vmem>>, %arg1: memref<128x256xf32, #tpu.memory_space<vmem>>, %arg2: memref<256x128xf32, #tpu.memory_space<vmem>>, %arg3: memref<1x128xf32, #tpu.memory_space<vmem>>, %arg4: memref<128x128xf32, #tpu.memory_space<vmem>>, %arg5: memref<1x128xf32, #tpu.memory_space<vmem>>, %arg6: memref<8x128xf32, #tpu.memory_space<vmem>>) attributes {dimension_semantics = [], scalar_prefetch = 0 : i64, scratch_operands = 0 : i64, tpu.core_type = #tpu.core_type<tc>} {
    %c0 = arith.constant 0 : index
    %c0_0 = arith.constant 0 : index
    %0 = vector.load %arg0[%c0, %c0_0] : memref<8x8xi32, #tpu.memory_space<vmem>>, vector<8x8xi32>
    %1 = vector.extract_strided_slice %0 {offsets = [0, 7], sizes = [8, 1], strides = [1, 1]} : vector<8x8xi32> to vector<8x1xi32>
    %2 = tpu.iota {dimensions = array<i32: 1>} : vector<8x128xi32>
    %3 = vector.broadcast %1 : vector<8x1xi32> to vector<8x128xi32>
    %4 = arith.cmpi eq, %2, %3 : vector<8x128xi32>
    %5 = arith.extui %4 : vector<8x128xi1> to vector<8x128xi32>
    %6 = arith.sitofp %5 : vector<8x128xi32> to vector<8x128xf32>
    %c0_1 = arith.constant 0 : index
    %c0_2 = arith.constant 0 : index
    %7 = vector.load %arg1[%c0_1, %c0_2] : memref<128x256xf32, #tpu.memory_space<vmem>>, vector<128x256xf32>
    %cst = arith.constant dense<0.000000e+00> : vector<8x256xf32>
    %8 = tpu.matmul %6, %7, %cst {dimension_numbers = #tpu.dot_dimension_numbers<[1], [0], [0], [1], [0, 0, 1, 1], [], []>} : vector<8x128xf32>, vector<128x256xf32>, vector<8x256xf32> -> vector<8x256xf32>
    %9 = math.tanh %8 : vector<8x256xf32>
    %c0_3 = arith.constant 0 : index
    %c0_4 = arith.constant 0 : index
    %10 = vector.load %arg2[%c0_3, %c0_4] : memref<256x128xf32, #tpu.memory_space<vmem>>, vector<256x128xf32>
    %cst_5 = arith.constant dense<0.000000e+00> : vector<8x128xf32>
    %11 = tpu.matmul %9, %10, %cst_5 {dimension_numbers = #tpu.dot_dimension_numbers<[1], [0], [0], [1], [0, 0, 1, 1], [], []>} : vector<8x256xf32>, vector<256x128xf32>, vector<8x128xf32> -> vector<8x128xf32>
    %c0_6 = arith.constant 0 : index
    %c0_7 = arith.constant 0 : index
    %12 = vector.load %arg3[%c0_6, %c0_7] : memref<1x128xf32, #tpu.memory_space<vmem>>, vector<1x128xf32>
    %13 = vector.broadcast %12 : vector<1x128xf32> to vector<8x128xf32>
    %14 = arith.addf %11, %13 : vector<8x128xf32>
    %15 = math.tanh %14 : vector<8x128xf32>
    %c0_8 = arith.constant 0 : index
    %c0_9 = arith.constant 0 : index
    %16 = vector.load %arg4[%c0_8, %c0_9] : memref<128x128xf32, #tpu.memory_space<vmem>>, vector<128x128xf32>
    %cst_10 = arith.constant dense<0.000000e+00> : vector<8x128xf32>
    %17 = tpu.matmul %15, %16, %cst_10 {dimension_numbers = #tpu.dot_dimension_numbers<[1], [0], [0], [1], [0, 0, 1, 1], [], []>} : vector<8x128xf32>, vector<128x128xf32>, vector<8x128xf32> -> vector<8x128xf32>
    %c0_11 = arith.constant 0 : index
    %c0_12 = arith.constant 0 : index
    %18 = vector.load %arg5[%c0_11, %c0_12] : memref<1x128xf32, #tpu.memory_space<vmem>>, vector<1x128xf32>
    %19 = vector.broadcast %18 : vector<1x128xf32> to vector<8x128xf32>
    %20 = arith.addf %17, %19 : vector<8x128xf32>
    %c0_13 = arith.constant 0 : index
    %c0_14 = arith.constant 0 : index
    %21 = vector.load %arg6[%c0_13, %c0_14] : memref<8x128xf32, #tpu.memory_space<vmem>>, vector<8x128xf32>
    tpu.vector_store %arg6[%c0_13, %c0_14], %20 {strides = array<i32>} : memref<8x128xf32, #tpu.memory_space<vmem>>, vector<8x128xf32>,
    return
  }
}

</mosaic_0001>

<bundles_post_ra>
// kernel: mlp_forward.1
= control target key start
LH: loop header
LB: loop body
LE: loop exit
PB: predicated region body
PF: predicated region fallthrough
CT: control target
= control target key end

     0   :  { %11 = vsyncpa [#allocation3], 0  ;;  %s759_s0 = inlined_call_operand.vmem [shape: s32[8,8], index: 0, kind: input, shape index: {}]   ;;  %s760_s1 = inlined_call_operand.hbm [shape: f32[128,256], index: 1, kind: input, shape index: {}]   ;;  %s761_s2 = inlined_call_operand.hbm [shape: f32[256,128], index: 2, kind: input, shape index: {}]   ;;  %s762_s3 = inlined_call_operand.vmem [shape: f32[1,128], index: 3, kind: input, shape index: {}]   ;;  %s763_s4 = inlined_call_operand.hbm [shape: f32[128,128], index: 4, kind: input, shape index: {}]   ;;  %s764_s5 = inlined_call_operand.vmem [shape: f32[1,128], index: 5, kind: input, shape index: {}]   ;;  %s765_s6 = inlined_call_operand.vmem [shape: f32[8,128], index: 6, kind: output, shape index: {}]  }
   0x1   :  { %12 = vsyncpa [#allocation5], 0  ;;  %s656_s21 = smov [#allocation4]   ;;  %s586_s25 = scalar_lea.hbm %s761_s2, 4096 }
   0x2   :  { %s32_s22 = sshll.u32 %s656_s21, 4  ;;  %p587_p0 = scmp.ne.s32.totalorder %s761_s2, %s586_s25  ;;  %s33_s22 = int_to_ptr.vmem [resolvable:$true] %s32_s22 }
   0x3   :  { %p590_p1 = scmp.lt.u32.totalorder %s586_s25, %s761_s2 }
   0x5   :  { %p592_p2 = pnand %p590_p1, %p587_p0 }
   0x7   :  { %595 = shalt.err (!%p592_p2)
}
   0x8   :  { %s596_s30 = scalar_lea.vmem %s33_s22, 4096  ;;  %p601_p4 = scmp.lt.s32.totalorder %s33_s22, %s33_s22 }
   0x9   :  { %p597_p3 = scmp.ne.s32.totalorder %s33_s22, %s596_s30  ;;  %p602_p5 = scmp.lt.s32.totalorder %s596_s30, %s596_s30 }
   0xb   :  { %p603_p6 = por %p602_p5, %p601_p4 }
   0xd   :  { %p604_p7 = pnand %p603_p6, %p597_p3 }
   0xf   :  { %607 = shalt.err (!%p604_p7)
}
  0x10   :  { %s657_s7 = smov 128   ;;  %s658_s8 = smov 8  }
  0x11   :  { %38 = dma.hbm_to_vmem [thread:$0]  %s761_s2, 4096, %s33_s22, [#allocation5], %s657_s7, %s657_s7, %s658_s8  }
  0x12   :  { %s659_s11 = smov [#allocation2]   ;;  %s608_s15 = scalar_lea.hbm %s760_s1, 4096 }
  0x13   :  { %s20_s12 = sshll.u32 %s659_s11, 4  ;;  %p609_p8 = scmp.ne.s32.totalorder %s760_s1, %s608_s15  ;;  %s21_s12 = int_to_ptr.vmem [resolvable:$true] %s20_s12 }
  0x14   :  { %p612_p9 = scmp.lt.u32.totalorder %s608_s15, %s760_s1 }
  0x16   :  { %p614_p10 = pnand %p612_p9, %p609_p8 }
  0x18   :  { %617 = shalt.err (!%p614_p10)
}
  0x19   :  { %s618_s20 = scalar_lea.vmem %s21_s12, 4096  ;;  %p623_p12 = scmp.lt.s32.totalorder %s21_s12, %s21_s12 }
  0x1a   :  { %p619_p11 = scmp.ne.s32.totalorder %s21_s12, %s618_s20  ;;  %p624_p13 = scmp.lt.s32.totalorder %s618_s20, %s618_s20 }
  0x1c   :  { %p625_p0 = por %p624_p13, %p623_p12 }
  0x1e   :  { %p626_p1 = pnand %p625_p0, %p619_p11 }
  0x20   :  { %629 = shalt.err (!%p626_p1)
}
  0x21   :  { %s660_s2 = smov 256   ;;  %s661_s21 = smov 16  }
  0x22   :  { %26 = dma.hbm_to_vmem [thread:$0]  %s760_s1, 4096, %s21_s12, [#allocation3], %s660_s2, %s660_s2, %s661_s21  }
  0x23   :  { %s662_s24 = smov [#allocation6]   ;;  %s630_s28 = scalar_lea.hbm %s763_s4, 2048 }
  0x24   :  { %s46_s25 = sshll.u32 %s662_s24, 4  ;;  %p631_p2 = scmp.ne.s32.totalorder %s763_s4, %s630_s28  ;;  %s47_s25 = int_to_ptr.vmem [resolvable:$true] %s46_s25 }
  0x25   :  { %p634_p3 = scmp.lt.u32.totalorder %s630_s28, %s763_s4 }
  0x27   :  { %p636_p4 = pnand %p634_p3, %p631_p2 }
  0x29   :  { %639 = shalt.err (!%p636_p4)
}
  0x2a   :  { %s640_s11 = scalar_lea.vmem %s47_s25, 2048  ;;  %p645_p6 = scmp.lt.s32.totalorder %s47_s25, %s47_s25 }
  0x2b   :  { %p641_p5 = scmp.ne.s32.totalorder %s47_s25, %s640_s11  ;;  %p646_p7 = scmp.lt.s32.totalorder %s640_s11, %s640_s11 }
  0x2d   :  { %p647_p8 = por %p646_p7, %p645_p6 }
  0x2f   :  { %p648_p9 = pnand %p647_p8, %p641_p5 }
  0x31   :  { %651 = shalt.err (!%p648_p9)
}
  0x32   :  { %52 = dma.hbm_to_vmem [thread:$0]  %s763_s4, 2048, %s47_s25, [#allocation5], %s657_s7, %s657_s7, %s658_s8  }
  0x33   :  { %652 = dma.done.wait [#allocation3], 4096  }
  0x34   :  { %653 = vsyncadd [#allocation3], 4294963200 }
  0x35   :  { %654 = dma.done.wait [#allocation5], 6144  }
  0x36   :  { %655 = vsyncadd [#allocation5], 4294961152  ;;  %v663_v0 = vmov 7   ;;  %v64_v1 = vld [vmem:[%s759_s0] sm:$0xff]  ;;  %v74_v2 = vld [vmem:[#allocation2 + $0x8] sm:$0xff]  ;;  %v664_v8 = vmov 0.0  }
  0x37   :  { %579 = vset.pattern.permute.xlu0 %v663_v0  ;;  %v76_v3 = vld [vmem:[#allocation2 + $0x18] sm:$0xff]  ;;  %v73_v5 = vld [vmem:[#allocation2] sm:$0xff]  ;;  %v75_v6 = vld [vmem:[#allocation2 + $0x10] sm:$0xff]  ;;  %169 = vmatprep.mubr.f32.mxu0 %v664_v8  ;;  %vm667_vm1 = vmmov 0  }
  0x38   :  { %68 = vperm.xlu0 %579, %v64_v1   ;;  %v479_v4 = vpack.c.bf16 %v76_v3, %v74_v2  ;;  %v78_v7 = vld [vmem:[#allocation2 + $0x28] sm:$0xff]  ;;  %v481_v9 = vpack.c.bf16 %v75_v6, %v73_v5  ;;  %v80_v10 = vld [vmem:[#allocation2 + $0x38] sm:$0xff]  ;;  %v77_v11 = vld [vmem:[#allocation2 + $0x20] sm:$0xff] }
  0x39   :  { %v79_v12 = vld [vmem:[#allocation2 + $0x30] sm:$0xff]  ;;  %v483_v13 = vpack.c.bf16 %v80_v10, %v78_v7  ;;  %v82_v14 = vld [vmem:[#allocation2 + $0x48] sm:$0xff]  ;;  %v84_v15 = vld [vmem:[#allocation2 + $0x58] sm:$0xff] }
  0x3a   :  { %480 = vmatprep.subr.bf16.mxu0 %v479_v4  ;;  %v485_v16 = vpack.c.bf16 %v79_v12, %v77_v11  ;;  %v487_v17 = vpack.c.bf16 %v84_v15, %v82_v14  ;;  %v81_v18 = vld [vmem:[#allocation2 + $0x40] sm:$0xff]  ;;  %v83_v19 = vld [vmem:[#allocation2 + $0x50] sm:$0xff]  ;;  %v86_v20 = vld [vmem:[#allocation2 + $0x68] sm:$0xff] }
  0x3b   :  { %482 = vmatpush1.bf16.msra.mxu0 %v481_v9  ;;  %v88_v21 = vld [vmem:[#allocation2 + $0x78] sm:$0xff]  ;;  %v489_v22 = vpack.c.bf16 %v83_v19, %v81_v18  ;;  %v85_v24 = vld [vmem:[#allocation2 + $0x60] sm:$0xff]  ;;  %v87_v25 = vld [vmem:[#allocation2 + $0x70] sm:$0xff]  ;;  %v65_v18 = vlaneseq }
  0x3c   :  { %484 = vmatprep.subr.bf16.mxu0 %v483_v13  ;;  %v491_v23 = vpack.c.bf16 %v88_v21, %v86_v20  ;;  %v90_v26 = vld [vmem:[#allocation2 + $0x88] sm:$0xff]  ;;  %v92_v27 = vld [vmem:[#allocation2 + $0x98] sm:$0xff]  ;;  %v89_v28 = vld [vmem:[#allocation2 + $0x80] sm:$0xff]  ;;  %v493_v33 = vpack.c.bf16 %v87_v25, %v85_v24  ;;  %v665_v21 = vmov 1.0  }
  0x3d   :  { %v91_v29 = vld [vmem:[#allocation2 + $0x90] sm:$0xff]  ;;  %v194_v30 = vld [vmem:[#allocation4 + $0x80] sm:$0xff]  ;;  %v195_v31 = vld [vmem:[#allocation4 + $0x88] sm:$0xff]  ;;  %v495_v38 = vpack.c.bf16 %v92_v27, %v90_v26  ;;  %v66_v19 = vand.u32 127, %v65_v18 }
  0x3e   :  { %v178_v32 = vld [vmem:[#allocation4] sm:$0xff]  ;;  %v511_v34 = vpack.c.bf16 %v195_v31, %v194_v30  ;;  %v179_v35 = vld [vmem:[#allocation4 + $0x8] sm:$0xff]  ;;  %v196_v36 = vld [vmem:[#allocation4 + $0x90] sm:$0xff]  ;;  %v497_v48 = vpack.c.bf16 %v91_v29, %v89_v28 }
  0x3f   :  { %486 = vmatpush1.bf16.msra.mxu0 %v485_v16  ;;  %v197_v37 = vld [vmem:[#allocation4 + $0x98] sm:$0xff]  ;;  %v513_v39 = vpack.c.bf16 %v179_v35, %v178_v32  ;;  %v180_v41 = vld [vmem:[#allocation4 + $0x10] sm:$0xff]  ;;  %v198_v43 = vld [vmem:[#allocation4 + $0xa0] sm:$0xff] }
  0x40   :  { %488 = vmatprep.subr.bf16.mxu0 %v487_v17  ;;  %v515_v40 = vpack.c.bf16 %v197_v37, %v196_v36  ;;  %v181_v42 = vld [vmem:[#allocation4 + $0x18] sm:$0xff]  ;;  %v94_v44 = vld [vmem:[#allocation2 + $0xa8] sm:$0xff]  ;;  %512 = vmatprep.subr.bf16.mxu1 %v511_v34  ;;  %v93_v49 = vld [vmem:[#allocation2 + $0xa0] sm:$0xff] }
  0x41   :  { %v96_v45 = vld [vmem:[#allocation2 + $0xb8] sm:$0xff]  ;;  %v199_v46 = vld [vmem:[#allocation4 + $0xa8] sm:$0xff]  ;;  %514 = vmatpush3.bf16.msra.mxu1 %v513_v39  ;;  %v517_v47 = vpack.c.bf16 %v181_v42, %v180_v41  ;;  %v182_v51 = vld [vmem:[#allocation4 + $0x20] sm:$0xff] }
  0x42   :  { %516 = vmatprep.subr.bf16.mxu1 %v515_v40  ;;  %v519_v50 = vpack.c.bf16 %v199_v46, %v198_v43  ;;  %v183_v52 = vld [vmem:[#allocation4 + $0x28] sm:$0xff]  ;;  %v499_v53 = vpack.c.bf16 %v96_v45, %v94_v44  ;;  %v95_v54 = vld [vmem:[#allocation2 + $0xb0] sm:$0xff]  ;;  %v201_v56 = vld [vmem:[#allocation4 + $0xb8] sm:$0xff]  ;;  %v666_v43 = vmov 0.0|0.0  }
  0x43   :  { %490 = vmatpush1.bf16.msra.mxu0 %v489_v22  ;;  %v200_v55 = vld [vmem:[#allocation4 + $0xb0] sm:$0xff]  ;;  %v98_v57 = vld [vmem:[#allocation2 + $0xc8] sm:$0xff]  ;;  %v100_v58 = vld [vmem:[#allocation2 + $0xd8] sm:$0xff]  ;;  %v521_v59 = vpack.c.bf16 %v183_v52, %v182_v51  ;;  %v501_v60 = vpack.c.bf16 %v95_v54, %v93_v49 }
  0x44   :  { %492 = vmatprep.subr.bf16.mxu0 %v491_v23  ;;  %v97_v61 = vld [vmem:[#allocation2 + $0xc0] sm:$0xff]  ;;  %v523_v62 = vpack.c.bf16 %v201_v56, %v200_v55  ;;  %v184_v63 = vld [vmem:[#allocation4 + $0x30] sm:$0xff]  ;;  %v185_v0 = vld [vmem:[#allocation4 + $0x38] sm:$0xff]  ;;  %v503_v1 = vpack.c.bf16 %v100_v58, %v98_v57 }
  0x45   :  { %518 = vmatpush3.bf16.msra.mxu1 %v517_v47  ;;  %v99_v2 = vld [vmem:[#allocation2 + $0xd0] sm:$0xff]  ;;  %v202_v3 = vld [vmem:[#allocation4 + $0xc0] sm:$0xff]  ;;  %v203_v4 = vld [vmem:[#allocation4 + $0xc8] sm:$0xff]  ;;  %v525_v7 = vpack.c.bf16 %v185_v0, %v184_v63 }
  0x46   :  { %520 = vmatprep.subr.bf16.mxu1 %v519_v50  ;;  %v102_v5 = vld [vmem:[#allocation2 + $0xe8] sm:$0xff]  ;;  %v104_v6 = vld [vmem:[#allocation2 + $0xf8] sm:$0xff]  ;;  %v505_v9 = vpack.c.bf16 %v99_v2, %v97_v61  ;;  %v527_v10 = vpack.c.bf16 %v203_v4, %v202_v3  ;;  %v186_v11 = vld [vmem:[#allocation4 + $0x40] sm:$0xff] }
  0x47   :  { %494 = vmatpush1.bf16.msra.mxu0 %v493_v33  ;;  %v187_v12 = vld [vmem:[#allocation4 + $0x48] sm:$0xff]  ;;  %v507_v13 = vpack.c.bf16 %v104_v6, %v102_v5  ;;  %v101_v14 = vld [vmem:[#allocation2 + $0xe0] sm:$0xff]  ;;  %v103_v15 = vld [vmem:[#allocation2 + $0xf0] sm:$0xff] }
  0x48   :  { %496 = vmatprep.subr.bf16.mxu0 %v495_v38  ;;  %v529_v16 = vpack.c.bf16 %v187_v12, %v186_v11  ;;  %v509_v17 = vpack.c.bf16 %v103_v15, %v101_v14  ;;  %v204_v22 = vld [vmem:[#allocation4 + $0xd0] sm:$0xff]  ;;  %v205_v23 = vld [vmem:[#allocation4 + $0xd8] sm:$0xff]  ;;  %v206_v28 = vld [vmem:[#allocation4 + $0xe0] sm:$0xff] }
  0x49   :  { %522 = vmatpush3.bf16.msra.mxu1 %v521_v59  ;;  %v531_v24 = vpack.c.bf16 %v205_v23, %v204_v22  ;;  %v188_v25 = vld [vmem:[#allocation4 + $0x50] sm:$0xff]  ;;  %v189_v26 = vld [vmem:[#allocation4 + $0x58] sm:$0xff]  ;;  %v207_v29 = vld [vmem:[#allocation4 + $0xe8] sm:$0xff] }
  0x4a   :  { %524 = vmatprep.subr.bf16.mxu1 %v523_v62  ;;  %v533_v27 = vpack.c.bf16 %v189_v26, %v188_v25  ;;  %v190_v30 = vld [vmem:[#allocation4 + $0x60] sm:$0xff]  ;;  %v535_v31 = vpack.c.bf16 %v207_v29, %v206_v28  ;;  %v191_v32 = vld [vmem:[#allocation4 + $0x68] sm:$0xff]  ;;  %v208_v33 = vld [vmem:[#allocation4 + $0xf0] sm:$0xff] }
  0x4b   :  { %498 = vmatpush1.bf16.msra.mxu0 %v497_v48  ;;  %v209_v34 = vld [vmem:[#allocation4 + $0xf8] sm:$0xff]  ;;  %v537_v35 = vpack.c.bf16 %v191_v32, %v190_v30  ;;  %v192_v37 = vld [vmem:[#allocation4 + $0x70] sm:$0xff]  ;;  %v288_v40 = vld [vmem:[#allocation6] sm:$0xff] }
  0x4c   :  { %500 = vmatprep.subr.bf16.mxu0 %v499_v53  ;;  %v539_v36 = vpack.c.bf16 %v209_v34, %v208_v33  ;;  %v193_v38 = vld [vmem:[#allocation4 + $0x78] sm:$0xff]  ;;  %v289_v41 = vld [vmem:[#allocation6 + $0x8] sm:$0xff]  ;;  %v290_v42 = vld [vmem:[#allocation6 + $0x10] sm:$0xff] }
  0x4d   :  { %526 = vmatpush3.bf16.msra.mxu1 %v525_v7  ;;  %v541_v39 = vpack.c.bf16 %v193_v38, %v192_v37  ;;  %v544_v44 = vpack.c.bf16 %v289_v41, %v288_v40  ;;  %v291_v45 = vld [vmem:[#allocation6 + $0x18] sm:$0xff]  ;;  %v292_v47 = vld [vmem:[#allocation6 + $0x20] sm:$0xff]  ;;  %v293_v48 = vld [vmem:[#allocation6 + $0x28] sm:$0xff] }
  0x4e   :  { %528 = vmatprep.subr.bf16.mxu1 %v527_v10  ;;  %v547_v46 = vpack.c.bf16 %v291_v45, %v290_v42  ;;  %v550_v49 = vpack.c.bf16 %v293_v48, %v292_v47  ;;  %v294_v50 = vld [vmem:[#allocation6 + $0x30] sm:$0xff]  ;;  %v295_v51 = vld [vmem:[#allocation6 + $0x38] sm:$0xff]  ;;  %v296_v57 = vld [vmem:[#allocation6 + $0x40] sm:$0xff] }
  0x4f   :  { %502 = vmatpush1.bf16.msra.mxu0 %v501_v60  ;;  %v553_v52 = vpack.c.bf16 %v295_v51, %v294_v50  ;;  %v297_v58 = vld [vmem:[#allocation6 + $0x48] sm:$0xff]  ;;  %v298_v60 = vld [vmem:[#allocation6 + $0x50] sm:$0xff]  ;;  %v299_v61 = vld [vmem:[#allocation6 + $0x58] sm:$0xff] }
  0x50   :  { %504 = vmatprep.subr.bf16.mxu0 %v503_v1  ;;  %v556_v59 = vpack.c.bf16 %v297_v58, %v296_v57  ;;  %v559_v62 = vpack.c.bf16 %v299_v61, %v298_v60  ;;  %v300_v63 = vld [vmem:[#allocation6 + $0x60] sm:$0xff]  ;;  %v301_v0 = vld [vmem:[#allocation6 + $0x68] sm:$0xff]  ;;  %v302_v2 = vld [vmem:[#allocation6 + $0x70] sm:$0xff] }
  0x51   :  { %530 = vmatpush3.bf16.msra.mxu1 %v529_v16  ;;  %v562_v1 = vpack.c.bf16 %v301_v0, %v300_v63  ;;  %v303_v3 = vld [vmem:[#allocation6 + $0x78] sm:$0xff]  ;;  %v390_v6 = vld [vmem:[%s762_s3] ss:$0 sm:$0xff] }
  0x52   :  { %532 = vmatprep.subr.bf16.mxu1 %v531_v24  ;;  %v565_v4 = vpack.c.bf16 %v303_v3, %v302_v2  ;;  %v391_v12 = vld [vmem:[%s764_s5] ss:$0 sm:$0xff] }
  0x53   :  { %506 = vmatpush1.bf16.msra.mxu0 %v505_v9 }
  0x54   :  { %508 = vmatprep.subr.bf16.mxu0 %v507_v13 }
  0x55   :  { %534 = vmatpush3.bf16.msra.mxu1 %v533_v27 }
  0x56   :  { %536 = vmatprep.subr.bf16.mxu1 %v535_v31 }
  0x57   :  { %510 = vmatpush1.bf16.msra.mxu0 %v509_v17 }
  0x58   :  { %543 = vmatprep.subr.bf16.mxu0 %v666_v43 }
  0x59   :  { %538 = vmatpush3.bf16.msra.mxu1 %v537_v35 }
  0x5a   :  { %540 = vmatprep.subr.bf16.mxu1 %v539_v36 }
  0x5d   :  { %542 = vmatpush3.bf16.msra.mxu1 %v541_v39 }
  0xb7   :  { %v69_v20 = vpop.permute.xlu0 %68 }
  0xb8   :  { %vm70_vm0 = vcmp.eq.s32.totalorder %v66_v19, %v69_v20 }
  0xb9   :  { %389 = vmatmul.mubr.msk.f32.vlgmr.msra.gmra.mrb[0].mxu0 %vm70_vm0, %v665_v21 }
  0xba   :  { %545 = vmatpush3.bf16.msra.mxu0 %v544_v44  ;;  %476 = vmatprep.mubr.msk.f32.mxu0 %vm667_vm1, %v664_v8 }
  0xbb   :  { %546 = vmatprep.subr.bf16.mxu0 %v666_v43 }
  0xbe   :  { %548 = vmatpush3.bf16.msra.mxu0 %v547_v46 }
  0xbf   :  { %549 = vmatprep.subr.bf16.mxu0 %v666_v43 }
  0xc2   :  { %551 = vmatpush3.bf16.msra.mxu0 %v550_v49 }
  0xc3   :  { %552 = vmatprep.subr.bf16.mxu0 %v666_v43 }
  0xc6   :  { %554 = vmatpush3.bf16.msra.mxu0 %v553_v52 }
  0xc7   :  { %555 = vmatprep.subr.bf16.mxu0 %v666_v43 }
  0xca   :  { %557 = vmatpush3.bf16.msra.mxu0 %v556_v59 }
  0xcb   :  { %558 = vmatprep.subr.bf16.mxu0 %v666_v43 }
  0xce   :  { %560 = vmatpush3.bf16.msra.mxu0 %v559_v62 }
  0xcf   :  { %561 = vmatprep.subr.bf16.mxu0 %v666_v43 }
  0xd2   :  { %563 = vmatpush3.bf16.msra.mxu0 %v562_v1 }
  0xd3   :  { %564 = vmatprep.subr.bf16.mxu0 %v666_v43 }
  0xd6   :  { %566 = vmatpush3.bf16.msra.mxu0 %v565_v4 }
 0x18c   :  { %v171_v53 = vpop.f32.mrb[0].mxu0 }
 0x18d   :  { %v173_v54 = vpop.f32.mrb[1].mxu0 }
 0x18e   :  { %580 = vtanh.f32 %v173_v54 }
 0x18f   :  { %582 = vtanh.f32 %v171_v53 }
 0x198   :  { %v581_v55 = vpop.eup %580 }
 0x199   :  { %v583_v56 = vpop.eup %582  ;;  %281 = vmatprep.mubr.f32.mxu1 %v581_v55 }
 0x19a   :  { %282 = vmatmul.mubr.f32.vlgmr.msra.gmra.mrb[0].mxu1 %v583_v56 }
 0x26d   :  { %v424_v5 = vpop.f32.mrb[0].mxu1 }
 0x26e   :  { %v425_v7 = vpop.f32.mrb[1].mxu1 }
 0x26f   :  { %v426_v9 = vadd.f32 %v425_v7, %v424_v5 }
 0x271   :  { %v284_v10 = vadd.f32 %v426_v9, %v390_v6 }
 0x273   :  { %584 = vtanh.f32 %v284_v10 }
 0x27d   :  { %v585_v11 = vpop.eup %584 }
 0x27e   :  { %477 = vmatmul.mubr.f32.vlgmr.msra.gmra.mrb[2].mxu0 %v585_v11 }
 0x351   :  { %v377_v8 = vpop.f32.mrb[2].mxu0 }
 0x352   :  { %v378_v13 = vadd.f32 %v391_v12, %v377_v8  ;;  %v478_v14 = vpop.f32.mrb[3].mxu0 }
 0x354   :  { %381 = vst [vmem:[%s765_s6] sm:$0xff] %v378_v13 }
 0x355   :  { %386 = vsyncpa [#allocation3], 1 }
 0x356   :  { %387 = vsyncpa [#allocation5], 1 }

</bundles_post_ra>
